<compile_context>
chip_gen: v7x
topology: tpu7x:2x2x1
jax: 0.10.0
libtpu: 0.0.40
codegen_flags: <defaults>
</compile_context>

<pallas_src>
import math

import jax
import jax.numpy as jnp
from jax.experimental import pallas as pl
from jax.experimental.pallas import tpu as pltpu

# config (small synthetic sizes consistent with the module)
B = 2          # batch_size
S = 8          # src_len
D_MODEL = 32
D_FF = 64
N_HEADS = 4
D_K = 8
D_V = 8
LN_EPS = 1e-5
G = B * N_HEADS   # fused (batch, head) dim used inside the kernel


def _layer_norm(x, eps=LN_EPS):
    # nn.LayerNorm created at forward time: weight=1, bias=0, biased variance.
    mean = jnp.mean(x, axis=-1, keepdims=True)
    var = jnp.mean((x - mean) ** 2, axis=-1, keepdims=True)
    return (x - mean) * jax.lax.rsqrt(var + eps)


def encoder_layer_kernel(x_ref, mask_ref, wq_ref, wk_ref, wv_ref, wo_ref,
                         w1_ref, w2_ref, out_ref, attn_ref):
    x = x_ref[...]                              # (B, S, D_MODEL)
    xf = x.reshape(B * S, D_MODEL)              # (B*S, D_MODEL)

    # Fused (batch, head) leading dim: broadcast activations over heads and weights over
    # batch.  Only leading-dim broadcasts / reshapes -> no lane shuffles, no transposes.
    x_g = jnp.broadcast_to(x[:, None], (B, N_HEADS, S, D_MODEL)).reshape(G, S, D_MODEL)
    wq_g = jnp.broadcast_to(wq_ref[...][None], (B, N_HEADS, D_MODEL, D_K)).reshape(G, D_MODEL, D_K)
    wk_g = jnp.broadcast_to(wk_ref[...][None], (B, N_HEADS, D_MODEL, D_K)).reshape(G, D_MODEL, D_K)
    wv_g = jnp.broadcast_to(wv_ref[...][None], (B, N_HEADS, D_MODEL, D_V)).reshape(G, D_MODEL, D_V)
    wo_g = jnp.broadcast_to(wo_ref[...][None], (B, N_HEADS, D_V, D_MODEL)).reshape(G, D_V, D_MODEL)

    # ---- Multi-head self attention (single batched contractions, batch dim = B*H) ----
    q = jnp.einsum('gsd,gdk->gsk', x_g, wq_g, preferred_element_type=jnp.float32)
    q = q * (1.0 / math.sqrt(D_K))              # scale once on Q, not per-head scores
    k = jnp.einsum('gsd,gdk->gsk', x_g, wk_g, preferred_element_type=jnp.float32)
    v = jnp.einsum('gsd,gdk->gsk', x_g, wv_g, preferred_element_type=jnp.float32)

    scores = jnp.einsum('gqd,gkd->gqk', q, k, preferred_element_type=jnp.float32)  # (G,S,S)
    mask = mask_ref[...]                        # (B, S, S) float32, 1.0 == masked
    mask_g = jnp.broadcast_to(mask[:, None], (B, N_HEADS, S, S)).reshape(G, S, S)
    scores = jnp.where(mask_g > 0.5, -1e9, scores)        # masked_fill_(attn_mask, -1e9)

    scores = scores - jnp.max(scores, axis=-1, keepdims=True)
    e = jnp.exp(scores)
    denom = jnp.sum(e, axis=-1, keepdims=True)
    attn = e * pl.reciprocal(denom, approx=True)           # divide on the EUP slot

    attn_ref[...] = attn.reshape(B, N_HEADS, S, S)          # one coalesced store

    ctx = jnp.einsum('gqk,gkd->gqd', attn, v, preferred_element_type=jnp.float32)  # (G,S,D_V)

    # Output projection without concatenating heads: project per head, sum over heads.
    proj = jnp.einsum('gsv,gvd->gsd', ctx, wo_g, preferred_element_type=jnp.float32)
    proj4 = proj.reshape(B, N_HEADS, S, D_MODEL)
    attn_out = proj4[:, 0]
    for h in range(1, N_HEADS):                 # static unroll, VPU adds only
        attn_out = attn_out + proj4[:, h]
    attn_out = attn_out.reshape(B * S, D_MODEL) + xf        # residual
    attn_out = _layer_norm(attn_out)

    # ---- Position-wise feed forward ---------------------------------------------------
    hidden = jnp.maximum(
        jnp.dot(attn_out, w1_ref[...], preferred_element_type=jnp.float32), 0.0)
    ffn_out = jnp.dot(hidden, w2_ref[...],
                      preferred_element_type=jnp.float32) + attn_out   # residual
    out_ref[...] = _layer_norm(ffn_out).reshape(B, S, D_MODEL)


def encoder_layer(x, mask_f32, wq, wk, wv, wo, w1, w2):
    """x: (B,S,D_MODEL) f32; mask_f32: (B,S,S) f32 with 1.0 = masked.
    Weights in (in_features, out_features) layout, matching the PyTorch module."""
    # Head-major weight layout prepared outside the kernel (pure layout plumbing).
    wq_h = wq.reshape(D_MODEL, N_HEADS, D_K).transpose(1, 0, 2)   # (H, D, D_K)
    wk_h = wk.reshape(D_MODEL, N_HEADS, D_K).transpose(1, 0, 2)   # (H, D, D_K)
    wv_h = wv.reshape(D_MODEL, N_HEADS, D_V).transpose(1, 0, 2)   # (H, D, D_V)
    wo_h = wo.reshape(N_HEADS, D_V, D_MODEL)                      # (H, D_V, D)

    out_shapes = (
        jax.ShapeDtypeStruct((B, S, D_MODEL), jnp.float32),
        jax.ShapeDtypeStruct((B, N_HEADS, S, S), jnp.float32),
    )
    vmem = pl.BlockSpec(memory_space=pltpu.MemorySpace.VMEM)
    # Single invocation (no grid): everything fits comfortably in VMEM, weights are
    # DMA'd once, and there is no per-batch grid-step overhead.
    return pl.pallas_call(
        encoder_layer_kernel,
        out_shape=out_shapes,
        in_specs=[vmem] * 8,
        out_specs=(vmem, vmem),
    )(x, mask_f32, wq_h, wk_h, wv_h, wo_h, w1, w2)


def encoder_layer_ref(x, mask_f32, wq, wk, wv, wo, w1, w2):
    """Pure-JAX reference for a correctness sanity check."""
    q = (x @ wq).reshape(B, S, N_HEADS, D_K).transpose(0, 2, 1, 3)
    k = (x @ wk).reshape(B, S, N_HEADS, D_K).transpose(0, 2, 1, 3)
    v = (x @ wv).reshape(B, S, N_HEADS, D_V).transpose(0, 2, 1, 3)
    scores = jnp.einsum("bhqd,bhkd->bhqk", q, k) / math.sqrt(D_K)
    scores = jnp.where(mask_f32[:, None] > 0.5, -1e9, scores)
    attn = jax.nn.softmax(scores, axis=-1)
    ctx = jnp.einsum("bhqk,bhkd->bhqd", attn, v).transpose(0, 2, 1, 3)
    ctx = ctx.reshape(B, S, N_HEADS * D_V)
    attn_out = _layer_norm(ctx @ wo + x)
    ffn_out = _layer_norm(jnp.maximum(attn_out @ w1, 0.0) @ w2 + attn_out)
    return ffn_out, attn


if __name__ == "__main__":
    key = jax.random.PRNGKey(0)
    kx, kq, kk, kv, ko, k1, k2 = jax.random.split(key, 7)

    x = jax.random.normal(kx, (B, S, D_MODEL), dtype=jnp.float32)

    # padding-style self-attention mask: 1.0 == masked out
    lens = jnp.array([6, 8], dtype=jnp.int32)              # valid lengths per batch
    key_pad = (jnp.arange(S)[None, :] >= lens[:, None])    # (B, S)
    mask = jnp.broadcast_to(key_pad[:, None, :], (B, S, S)).astype(jnp.float32)

    scale = 0.05
    wq = scale * jax.random.normal(kq, (D_MODEL, N_HEADS * D_K), dtype=jnp.float32)
    wk = scale * jax.random.normal(kk, (D_MODEL, N_HEADS * D_K), dtype=jnp.float32)
    wv = scale * jax.random.normal(kv, (D_MODEL, N_HEADS * D_V), dtype=jnp.float32)
    wo = scale * jax.random.normal(ko, (N_HEADS * D_V, D_MODEL), dtype=jnp.float32)
    w1 = scale * jax.random.normal(k1, (D_MODEL, D_FF), dtype=jnp.float32)
    w2 = scale * jax.random.normal(k2, (D_FF, D_MODEL), dtype=jnp.float32)

    out, attn = encoder_layer(x, mask, wq, wk, wv, wo, w1, w2)
    jax.block_until_ready((out, attn))

    out_expected, attn_expected = encoder_layer_ref(x, mask, wq, wk, wv, wo, w1, w2)
    assert out.shape == (B, S, D_MODEL) and attn.shape == (B, N_HEADS, S, S)
    # Tolerance accounts for the EUP approximate-reciprocal softmax denominator.
    assert jnp.allclose(out, out_expected, atol=5e-3, rtol=5e-3)
    assert jnp.allclose(attn, attn_expected, atol=5e-3, rtol=5e-3)

    print("KERNEL_OK")
</pallas_src>

<mosaic_0001>
module attributes {stable_mosaic.version = 11 : i64} {
  func.func @encoder_layer_kernel(%arg0: memref<2x8x32xf32, #tpu.memory_space<vmem>>, %arg1: memref<2x8x8xf32, #tpu.memory_space<vmem>>, %arg2: memref<4x32x8xf32, #tpu.memory_space<vmem>>, %arg3: memref<4x32x8xf32, #tpu.memory_space<vmem>>, %arg4: memref<4x32x8xf32, #tpu.memory_space<vmem>>, %arg5: memref<4x8x32xf32, #tpu.memory_space<vmem>>, %arg6: memref<32x64xf32, #tpu.memory_space<vmem>>, %arg7: memref<64x32xf32, #tpu.memory_space<vmem>>, %arg8: memref<2x8x32xf32, #tpu.memory_space<vmem>>, %arg9: memref<2x4x8x8xf32, #tpu.memory_space<vmem>>) attributes {dimension_semantics = [], scalar_prefetch = 0 : i64, scratch_operands = 0 : i64, tpu.core_type = #tpu.core_type<tc>} {
    %c0 = arith.constant 0 : index
    %c0_0 = arith.constant 0 : index
    %c0_1 = arith.constant 0 : index
    %0 = vector.load %arg0[%c0, %c0_0, %c0_1] : memref<2x8x32xf32, #tpu.memory_space<vmem>>, vector<2x8x32xf32>
    %1 = vector.shape_cast %0 : vector<2x8x32xf32> to vector<16x32xf32>
    %2 = vector.shape_cast %0 : vector<2x8x32xf32> to vector<2x1x8x32xf32>
    %3 = vector.shape_cast %2 : vector<2x1x8x32xf32> to vector<2x1x8x32xf32>
    %4 = vector.broadcast %3 : vector<2x1x8x32xf32> to vector<2x4x8x32xf32>
    %5 = vector.shape_cast %4 : vector<2x4x8x32xf32> to vector<8x8x32xf32>
    %c0_2 = arith.constant 0 : index
    %c0_3 = arith.constant 0 : index
    %c0_4 = arith.constant 0 : index
    %6 = vector.load %arg2[%c0_2, %c0_3, %c0_4] : memref<4x32x8xf32, #tpu.memory_space<vmem>>, vector<4x32x8xf32>
    %7 = vector.shape_cast %6 : vector<4x32x8xf32> to vector<1x4x32x8xf32>
    %8 = vector.shape_cast %7 : vector<1x4x32x8xf32> to vector<1x4x32x8xf32>
    %9 = vector.broadcast %8 : vector<1x4x32x8xf32> to vector<2x4x32x8xf32>
    %10 = vector.shape_cast %9 : vector<2x4x32x8xf32> to vector<8x32x8xf32>
    %c0_5 = arith.constant 0 : index
    %c0_6 = arith.constant 0 : index
    %c0_7 = arith.constant 0 : index
    %11 = vector.load %arg3[%c0_5, %c0_6, %c0_7] : memref<4x32x8xf32, #tpu.memory_space<vmem>>, vector<4x32x8xf32>
    %12 = vector.shape_cast %11 : vector<4x32x8xf32> to vector<1x4x32x8xf32>
    %13 = vector.shape_cast %12 : vector<1x4x32x8xf32> to vector<1x4x32x8xf32>
    %14 = vector.broadcast %13 : vector<1x4x32x8xf32> to vector<2x4x32x8xf32>
    %15 = vector.shape_cast %14 : vector<2x4x32x8xf32> to vector<8x32x8xf32>
    %c0_8 = arith.constant 0 : index
    %c0_9 = arith.constant 0 : index
    %c0_10 = arith.constant 0 : index
    %16 = vector.load %arg4[%c0_8, %c0_9, %c0_10] : memref<4x32x8xf32, #tpu.memory_space<vmem>>, vector<4x32x8xf32>
    %17 = vector.shape_cast %16 : vector<4x32x8xf32> to vector<1x4x32x8xf32>
    %18 = vector.shape_cast %17 : vector<1x4x32x8xf32> to vector<1x4x32x8xf32>
    %19 = vector.broadcast %18 : vector<1x4x32x8xf32> to vector<2x4x32x8xf32>
    %20 = vector.shape_cast %19 : vector<2x4x32x8xf32> to vector<8x32x8xf32>
    %c0_11 = arith.constant 0 : index
    %c0_12 = arith.constant 0 : index
    %c0_13 = arith.constant 0 : index
    %21 = vector.load %arg5[%c0_11, %c0_12, %c0_13] : memref<4x8x32xf32, #tpu.memory_space<vmem>>, vector<4x8x32xf32>
    %22 = vector.shape_cast %21 : vector<4x8x32xf32> to vector<1x4x8x32xf32>
    %23 = vector.shape_cast %22 : vector<1x4x8x32xf32> to vector<1x4x8x32xf32>
    %24 = vector.broadcast %23 : vector<1x4x8x32xf32> to vector<2x4x8x32xf32>
    %25 = vector.shape_cast %24 : vector<2x4x8x32xf32> to vector<8x8x32xf32>
    "tpu.trace_start"() <{level = 10 : i32, message = "gsd,gdk->gsk"}> : () -> ()
    %cst = arith.constant dense<0.000000e+00> : vector<8x8x8xf32>
    %26 = tpu.matmul %5, %10, %cst {dimension_numbers = #tpu.dot_dimension_numbers<[2], [1], [1], [2], [0, 0, 0, 1, 1, 2], [0], [0]>} : vector<8x8x32xf32>, vector<8x32x8xf32>, vector<8x8x8xf32> -> vector<8x8x8xf32>
    "tpu.trace_stop"() : () -> ()
    %cst_14 = arith.constant 0.353553385 : f32
    %27 = vector.broadcast %cst_14 : f32 to vector<8x8x8xf32>
    %28 = arith.mulf %26, %27 : vector<8x8x8xf32>
    "tpu.trace_start"() <{level = 10 : i32, message = "gsd,gdk->gsk"}> : () -> ()
    %cst_15 = arith.constant dense<0.000000e+00> : vector<8x8x8xf32>
    %29 = tpu.matmul %5, %15, %cst_15 {dimension_numbers = #tpu.dot_dimension_numbers<[2], [1], [1], [2], [0, 0, 0, 1, 1, 2], [0], [0]>} : vector<8x8x32xf32>, vector<8x32x8xf32>, vector<8x8x8xf32> -> vector<8x8x8xf32>
    %cst_16 = arith.constant dense<0.000000e+00> : vector<8x8x8xf32>
    %30 = tpu.matmul %5, %20, %cst_16 {dimension_numbers = #tpu.dot_dimension_numbers<[2], [1], [1], [2], [0, 0, 0, 1, 1, 2], [0], [0]>} : vector<8x8x32xf32>, vector<8x32x8xf32>, vector<8x8x8xf32> -> vector<8x8x8xf32>
    "tpu.trace_stop"() : () -> ()
    "tpu.trace_start"() <{level = 10 : i32, message = "gqd,gkd->gqk"}> : () -> ()
    %cst_17 = arith.constant dense<0.000000e+00> : vector<8x8x8xf32>
    %31 = tpu.matmul %28, %29, %cst_17 {dimension_numbers = #tpu.dot_dimension_numbers<[2], [2], [1], [1], [0, 0, 0, 1, 1, 1], [0], [0]>} : vector<8x8x8xf32>, vector<8x8x8xf32>, vector<8x8x8xf32> -> vector<8x8x8xf32>
    "tpu.trace_stop"() : () -> ()
    %c0_18 = arith.constant 0 : index
    %c0_19 = arith.constant 0 : index
    %c0_20 = arith.constant 0 : index
    %32 = vector.load %arg1[%c0_18, %c0_19, %c0_20] : memref<2x8x8xf32, #tpu.memory_space<vmem>>, vector<2x8x8xf32>
    %33 = vector.shape_cast %32 : vector<2x8x8xf32> to vector<2x1x8x8xf32>
    %34 = vector.shape_cast %33 : vector<2x1x8x8xf32> to vector<2x1x8x8xf32>
    %35 = vector.broadcast %34 : vector<2x1x8x8xf32> to vector<2x4x8x8xf32>
    %36 = vector.shape_cast %35 : vector<2x4x8x8xf32> to vector<8x8x8xf32>
    %cst_21 = arith.constant 5.000000e-01 : f32
    %37 = vector.broadcast %cst_21 : f32 to vector<8x8x8xf32>
    %38 = arith.cmpf ogt, %36, %37 : vector<8x8x8xf32>
    %cst_22 = arith.constant -1.000000e+09 : f32
    %39 = vector.broadcast %cst_22 : f32 to vector<8x8x8xf32>
    %40 = arith.select %38, %39, %31 : vector<8x8x8xi1>, vector<8x8x8xf32>
    %cst_23 = arith.constant dense<0xFF800000> : vector<8x8xf32>
    %41 = vector.multi_reduction <maximumf>, %40, %cst_23 [2] : vector<8x8x8xf32> to vector<8x8xf32>
    %42 = vector.shape_cast %41 : vector<8x8xf32> to vector<8x8x1xf32>
    %43 = vector.broadcast %42 : vector<8x8x1xf32> to vector<8x8x8xf32>
    %44 = arith.subf %40, %43 : vector<8x8x8xf32>
    %45 = math.exp %44 : vector<8x8x8xf32>
    %cst_24 = arith.constant dense<0.000000e+00> : vector<8x8xf32>
    %46 = vector.multi_reduction <add>, %45, %cst_24 [2] : vector<8x8x8xf32> to vector<8x8xf32>
    %47 = vector.shape_cast %46 : vector<8x8xf32> to vector<8x8x1xf32>
    %48 = tpu.reciprocal %47 {approx = true} : vector<8x8x1xf32> -> vector<8x8x1xf32>
    %49 = vector.broadcast %48 : vector<8x8x1xf32> to vector<8x8x8xf32>
    %50 = arith.mulf %45, %49 : vector<8x8x8xf32>
    %51 = vector.shape_cast %50 : vector<8x8x8xf32> to vector<2x4x8x8xf32>
    %c0_25 = arith.constant 0 : index
    %c0_26 = arith.constant 0 : index
    %c0_27 = arith.constant 0 : index
    %c0_28 = arith.constant 0 : index
    %52 = vector.load %arg9[%c0_25, %c0_26, %c0_27, %c0_28] : memref<2x4x8x8xf32, #tpu.memory_space<vmem>>, vector<2x4x8x8xf32>
    tpu.vector_store %arg9[%c0_25, %c0_26, %c0_27, %c0_28], %51 {strides = array<i32>} : memref<2x4x8x8xf32, #tpu.memory_space<vmem>>, vector<2x4x8x8xf32>,
    "tpu.trace_start"() <{level = 10 : i32, message = "gqk,gkd->gqd"}> : () -> ()
    %cst_29 = arith.constant dense<0.000000e+00> : vector<8x8x8xf32>
    %53 = tpu.matmul %50, %30, %cst_29 {dimension_numbers = #tpu.dot_dimension_numbers<[2], [1], [1], [2], [0, 0, 0, 1, 1, 2], [0], [0]>} : vector<8x8x8xf32>, vector<8x8x8xf32>, vector<8x8x8xf32> -> vector<8x8x8xf32>
    "tpu.trace_stop"() : () -> ()
    "tpu.trace_start"() <{level = 10 : i32, message = "gsv,gvd->gsd"}> : () -> ()
    %cst_30 = arith.constant dense<0.000000e+00> : vector<8x8x32xf32>
    %54 = tpu.matmul %53, %25, %cst_30 {dimension_numbers = #tpu.dot_dimension_numbers<[2], [1], [1], [2], [0, 0, 0, 1, 1, 2], [0], [0]>} : vector<8x8x8xf32>, vector<8x8x32xf32>, vector<8x8x32xf32> -> vector<8x8x32xf32>
    "tpu.trace_stop"() : () -> ()
    %55 = vector.shape_cast %54 : vector<8x8x32xf32> to vector<2x4x8x32xf32>
    %56 = vector.extract_strided_slice %55 {offsets = [0, 0, 0, 0], sizes = [2, 1, 8, 32], strides = [1, 1, 1, 1]} : vector<2x4x8x32xf32> to vector<2x1x8x32xf32>
    %57 = vector.shape_cast %56 : vector<2x1x8x32xf32> to vector<2x8x32xf32>
    %58 = vector.extract_strided_slice %55 {offsets = [0, 1, 0, 0], sizes = [2, 1, 8, 32], strides = [1, 1, 1, 1]} : vector<2x4x8x32xf32> to vector<2x1x8x32xf32>
    %59 = vector.shape_cast %58 : vector<2x1x8x32xf32> to vector<2x8x32xf32>
    %60 = arith.addf %57, %59 : vector<2x8x32xf32>
    %61 = vector.extract_strided_slice %55 {offsets = [0, 2, 0, 0], sizes = [2, 1, 8, 32], strides = [1, 1, 1, 1]} : vector<2x4x8x32xf32> to vector<2x1x8x32xf32>
    %62 = vector.shape_cast %61 : vector<2x1x8x32xf32> to vector<2x8x32xf32>
    %63 = arith.addf %60, %62 : vector<2x8x32xf32>
    %64 = vector.extract_strided_slice %55 {offsets = [0, 3, 0, 0], sizes = [2, 1, 8, 32], strides = [1, 1, 1, 1]} : vector<2x4x8x32xf32> to vector<2x1x8x32xf32>
    %65 = vector.shape_cast %64 : vector<2x1x8x32xf32> to vector<2x8x32xf32>
    %66 = arith.addf %63, %65 : vector<2x8x32xf32>
    %67 = vector.shape_cast %66 : vector<2x8x32xf32> to vector<16x32xf32>
    %68 = arith.addf %67, %1 : vector<16x32xf32>
    %cst_31 = arith.constant dense<0.000000e+00> : vector<16xf32>
    %69 = vector.multi_reduction <add>, %68, %cst_31 [1] : vector<16x32xf32> to vector<16xf32>
    %70 = vector.shape_cast %69 : vector<16xf32> to vector<16x1xf32>
    %cst_32 = arith.constant 3.200000e+01 : f32
    %71 = vector.broadcast %cst_32 : f32 to vector<16x1xf32>
    %72 = arith.divf %70, %71 : vector<16x1xf32>
    %73 = vector.broadcast %72 : vector<16x1xf32> to vector<16x32xf32>
    %74 = arith.subf %68, %73 : vector<16x32xf32>
    %75 = arith.mulf %74, %74 : vector<16x32xf32>
    %cst_33 = arith.constant dense<0.000000e+00> : vector<16xf32>
    %76 = vector.multi_reduction <add>, %75, %cst_33 [1] : vector<16x32xf32> to vector<16xf32>
    %77 = vector.shape_cast %76 : vector<16xf32> to vector<16x1xf32>
    %cst_34 = arith.constant 3.200000e+01 : f32
    %78 = vector.broadcast %cst_34 : f32 to vector<16x1xf32>
    %79 = arith.divf %77, %78 : vector<16x1xf32>
    %80 = vector.broadcast %72 : vector<16x1xf32> to vector<16x32xf32>
    %81 = arith.subf %68, %80 : vector<16x32xf32>
    %cst_35 = arith.constant 9.99999974E-6 : f32
    %82 = vector.broadcast %cst_35 : f32 to vector<16x1xf32>
    %83 = arith.addf %79, %82 : vector<16x1xf32>
    %84 = math.rsqrt %83 : vector<16x1xf32>
    %85 = vector.broadcast %84 : vector<16x1xf32> to vector<16x32xf32>
    %86 = arith.mulf %81, %85 : vector<16x32xf32>
    %c0_36 = arith.constant 0 : index
    %c0_37 = arith.constant 0 : index
    %87 = vector.load %arg6[%c0_36, %c0_37] : memref<32x64xf32, #tpu.memory_space<vmem>>, vector<32x64xf32>
    %cst_38 = arith.constant dense<0.000000e+00> : vector<16x64xf32>
    %88 = tpu.matmul %86, %87, %cst_38 {dimension_numbers = #tpu.dot_dimension_numbers<[1], [0], [0], [1], [0, 0, 1, 1], [], []>} : vector<16x32xf32>, vector<32x64xf32>, vector<16x64xf32> -> vector<16x64xf32>
    %cst_39 = arith.constant 0.000000e+00 : f32
    %89 = vector.broadcast %cst_39 : f32 to vector<16x64xf32>
    %90 = arith.maximumf %88, %89 : vector<16x64xf32>
    %c0_40 = arith.constant 0 : index
    %c0_41 = arith.constant 0 : index
    %91 = vector.load %arg7[%c0_40, %c0_41] : memref<64x32xf32, #tpu.memory_space<vmem>>, vector<64x32xf32>
    %cst_42 = arith.constant dense<0.000000e+00> : vector<16x32xf32>
    %92 = tpu.matmul %90, %91, %cst_42 {dimension_numbers = #tpu.dot_dimension_numbers<[1], [0], [0], [1], [0, 0, 1, 1], [], []>} : vector<16x64xf32>, vector<64x32xf32>, vector<16x32xf32> -> vector<16x32xf32>
    %93 = arith.addf %92, %86 : vector<16x32xf32>
    %cst_43 = arith.constant dense<0.000000e+00> : vector<16xf32>
    %94 = vector.multi_reduction <add>, %93, %cst_43 [1] : vector<16x32xf32> to vector<16xf32>
    %95 = vector.shape_cast %94 : vector<16xf32> to vector<16x1xf32>
    %cst_44 = arith.constant 3.200000e+01 : f32
    %96 = vector.broadcast %cst_44 : f32 to vector<16x1xf32>
    %97 = arith.divf %95, %96 : vector<16x1xf32>
    %98 = vector.broadcast %97 : vector<16x1xf32> to vector<16x32xf32>
    %99 = arith.subf %93, %98 : vector<16x32xf32>
    %100 = arith.mulf %99, %99 : vector<16x32xf32>
    %cst_45 = arith.constant dense<0.000000e+00> : vector<16xf32>
    %101 = vector.multi_reduction <add>, %100, %cst_45 [1] : vector<16x32xf32> to vector<16xf32>
    %102 = vector.shape_cast %101 : vector<16xf32> to vector<16x1xf32>
    %cst_46 = arith.constant 3.200000e+01 : f32
    %103 = vector.broadcast %cst_46 : f32 to vector<16x1xf32>
    %104 = arith.divf %102, %103 : vector<16x1xf32>
    %105 = vector.broadcast %97 : vector<16x1xf32> to vector<16x32xf32>
    %106 = arith.subf %93, %105 : vector<16x32xf32>
    %cst_47 = arith.constant 9.99999974E-6 : f32
    %107 = vector.broadcast %cst_47 : f32 to vector<16x1xf32>
    %108 = arith.addf %104, %107 : vector<16x1xf32>
    %109 = math.rsqrt %108 : vector<16x1xf32>
    %110 = vector.broadcast %109 : vector<16x1xf32> to vector<16x32xf32>
    %111 = arith.mulf %106, %110 : vector<16x32xf32>
    %112 = vector.shape_cast %111 : vector<16x32xf32> to vector<2x8x32xf32>
    %c0_48 = arith.constant 0 : index
    %c0_49 = arith.constant 0 : index
    %c0_50 = arith.constant 0 : index
    %113 = vector.load %arg8[%c0_48, %c0_49, %c0_50] : memref<2x8x32xf32, #tpu.memory_space<vmem>>, vector<2x8x32xf32>
    tpu.vector_store %arg8[%c0_48, %c0_49, %c0_50], %112 {strides = array<i32>} : memref<2x8x32xf32, #tpu.memory_space<vmem>>, vector<2x8x32xf32>,
    return
  }
}

</mosaic_0001>

<bundles_post_ra>
// kernel: tpu_custom_call.1
= control target key start
LH: loop header
LB: loop body
LE: loop exit
PB: predicated region body
PF: predicated region fallthrough
CT: control target
= control target key end

     0   :  { %15 = vsyncpa [#allocation3], 0  ;;  %v4861_v3 = vmov 0.0|0.0   ;;  %vm4862_vm0 = vmmov 0   ;;  %v4863_v11 = vmov 0.0   ;;  %vm87_vm1 = vcmask 261120   ;;  %s5478_s0 = inlined_call_operand.vmem [shape: f32[2,8,32], index: 0, kind: input, shape index: {}]   ;;  %s5479_s1 = inlined_call_operand.vmem [shape: f32[2,8,8], index: 1, kind: input, shape index: {}]   ;;  %s5480_s2 = inlined_call_operand.vmem [shape: f32[4,32,8], index: 2, kind: input, shape index: {}]   ;;  %s5481_s3 = inlined_call_operand.vmem [shape: f32[4,32,8], index: 3, kind: input, shape index: {}]   ;;  %s5482_s4 = inlined_call_operand.vmem [shape: f32[4,32,8], index: 4, kind: input, shape index: {}]   ;;  %s5483_s5 = inlined_call_operand.vmem [shape: f32[4,8,32], index: 5, kind: input, shape index: {}]   ;;  %s5484_s6 = inlined_call_operand.vmem [shape: f32[32,64], index: 6, kind: input, shape index: {}]   ;;  %s5485_s7 = inlined_call_operand.vmem [shape: f32[64,32], index: 7, kind: input, shape index: {}]   ;;  %s5486_s8 = inlined_call_operand.hbm [shape: f32[2,8,32], index: 8, kind: output, shape index: {0}]   ;;  %s5487_s9 = inlined_call_operand.hbm [shape: f32[2,4,8,8], index: 9, kind: output, shape index: {1}]  }
   0x1   :  { %v35_v0 = vld [vmem:[%s5480_s2] sm:$0xff]  ;;  %v36_v1 = vld [vmem:[%s5480_s2 + $0x8] sm:$0xff]  ;;  %4597 = vmatprep.subr.bf16.mxu0 %v4861_v3  ;;  %4603 = vmatprep.subr.bf16.mxu1 %v4861_v3  ;;  %v37_v6 = vld [vmem:[%s5480_s2 + $0x10] sm:$0xff] }
   0x2   :  { %v39_v2 = vld [vmem:[%s5480_s2 + $0x20] sm:$0xff]  ;;  %v4598_v4 = vpack.c.bf16 %v36_v1, %v35_v0  ;;  %v40_v5 = vld [vmem:[%s5480_s2 + $0x28] sm:$0xff]  ;;  %v38_v7 = vld [vmem:[%s5480_s2 + $0x18] sm:$0xff]  ;;  %4191 = vmatprep.mubr.msk.f32.mxu0 %vm4862_vm0, %v4863_v11  ;;  %4202 = vmatprep.mubr.msk.f32.mxu1 %vm4862_vm0, %v4863_v11 }
   0x3   :  { %v4604_v8 = vpack.c.bf16 %v40_v5, %v39_v2  ;;  %v41_v9 = vld [vmem:[%s5480_s2 + $0x30] sm:$0xff]  ;;  %v42_v10 = vld [vmem:[%s5480_s2 + $0x38] sm:$0xff]  ;;  %v4601_v12 = vpack.c.bf16 %v38_v7, %v37_v6  ;;  %v43_v14 = vld [vmem:[%s5480_s2 + $0x40] sm:$0xff] }
   0x4   :  { %4599 = vmatpush3.bf16.msra.mxu0 %v4598_v4  ;;  %v4607_v13 = vpack.c.bf16 %v42_v10, %v41_v9  ;;  %v44_v15 = vld [vmem:[%s5480_s2 + $0x48] sm:$0xff]  ;;  %v47_v16 = vld [vmem:[%s5480_s2 + $0x60] sm:$0xff]  ;;  %v45_v21 = vld [vmem:[%s5480_s2 + $0x50] sm:$0xff] }
   0x5   :  { %4605 = vmatpush3.bf16.msra.mxu1 %v4604_v8  ;;  %4600 = vmatprep.subr.bf16.mxu0 %v4861_v3  ;;  %v48_v17 = vld [vmem:[%s5480_s2 + $0x68] sm:$0xff]  ;;  %v4965_v18 = vld [vmem:[%s5478_s0] sm:$0xff]  ;;  %v4610_v19 = vpack.c.bf16 %v44_v15, %v43_v14  ;;  %v46_v22 = vld [vmem:[%s5480_s2 + $0x58] sm:$0xff] }
   0x6   :  { %4606 = vmatprep.subr.bf16.mxu1 %v4861_v3  ;;  %v4616_v20 = vpack.c.bf16 %v48_v17, %v47_v16  ;;  %v49_v23 = vld [vmem:[%s5480_s2 + $0x70] sm:$0xff]  ;;  %v50_v24 = vld [vmem:[%s5480_s2 + $0x78] sm:$0xff]  ;;  %v4613_v25 = vpack.c.bf16 %v46_v22, %v45_v21 }
   0x7   :  { %v4619_v26 = vpack.c.bf16 %v50_v24, %v49_v23 }
   0x8   :  { %4602 = vmatpush3.bf16.msra.mxu0 %v4601_v12 }
   0x9   :  { %4608 = vmatpush3.bf16.msra.mxu1 %v4607_v13  ;;  %4609 = vmatprep.subr.bf16.mxu0 %v4861_v3 }
   0xa   :  { %4615 = vmatprep.subr.bf16.mxu1 %v4861_v3 }
   0xb   :  { %4192 = vmatmul.mubr.msk.f32.vlgmr.msra.gmra.mrb[0].mxu0 %vm87_vm1, %v4965_v18 }
   0xc   :  { %4203 = vmatmul.mubr.msk.f32.vlgmr.msra.gmra.mrb[0].mxu1 %vm87_vm1, %v4965_v18  ;;  %4611 = vmatpush3.bf16.msra.mxu0 %v4610_v19 }
   0xd   :  { %4617 = vmatpush3.bf16.msra.mxu1 %v4616_v20  ;;  %4612 = vmatprep.subr.bf16.mxu0 %v4861_v3 }
   0xe   :  { %16 = vsyncpa [#allocation5], 0  ;;  %4618 = vmatprep.subr.bf16.mxu1 %v4861_v3  ;;  %4213 = vmatprep.mubr.msk.f32.mxu0 %vm4862_vm0, %v4863_v11  ;;  %v5006_v27 = vld [vmem:[%s5478_s0 + $0x8] sm:$0xff]  ;;  %v51_v28 = vld [vmem:[%s5481_s3] sm:$0xff]  ;;  %vm1782_vm2 = vcmask 64512   ;;  %vm3797_vm5 = vcmask 523264  }
   0xf   :  { %4224 = vmatprep.mubr.msk.f32.mxu1 %vm4862_vm0, %v4863_v11  ;;  %v52_v29 = vld [vmem:[%s5481_s3 + $0x8] sm:$0xff]  ;;  %v55_v30 = vld [vmem:[%s5481_s3 + $0x20] sm:$0xff]  ;;  %v53_v34 = vld [vmem:[%s5481_s3 + $0x10] sm:$0xff] }
  0x10   :  { %4614 = vmatpush3.bf16.msra.mxu0 %v4613_v25  ;;  %v56_v31 = vld [vmem:[%s5481_s3 + $0x28] sm:$0xff]  ;;  %v4646_v32 = vpack.c.bf16 %v52_v29, %v51_v28  ;;  %v54_v35 = vld [vmem:[%s5481_s3 + $0x18] sm:$0xff]  ;;  %v57_v36 = vld [vmem:[%s5481_s3 + $0x30] sm:$0xff] }
  0x11   :  { %4620 = vmatpush3.bf16.msra.mxu1 %v4619_v26  ;;  %4621 = vmatprep.subr.bf16.mxu0 %v4861_v3  ;;  %v4652_v33 = vpack.c.bf16 %v56_v31, %v55_v30  ;;  %v58_v37 = vld [vmem:[%s5481_s3 + $0x38] sm:$0xff]  ;;  %v4649_v38 = vpack.c.bf16 %v54_v35, %v53_v34  ;;  %v59_v40 = vld [vmem:[%s5481_s3 + $0x40] sm:$0xff]  ;;  %v60_v41 = vld [vmem:[%s5481_s3 + $0x48] sm:$0xff] }
  0x12   :  { %4627 = vmatprep.subr.bf16.mxu1 %v4861_v3  ;;  %v4655_v39 = vpack.c.bf16 %v58_v37, %v57_v36  ;;  %v63_v42 = vld [vmem:[%s5481_s3 + $0x60] sm:$0xff]  ;;  %v64_v43 = vld [vmem:[%s5481_s3 + $0x68] sm:$0xff]  ;;  %v4658_v44 = vpack.c.bf16 %v60_v41, %v59_v40  ;;  %v61_v46 = vld [vmem:[%s5481_s3 + $0x50] sm:$0xff] }
  0x13   :  { %4214 = vmatmul.mubr.msk.f32.vlgmr.msra.gmra.mrb[2].mxu0 %vm87_vm1, %v4965_v18  ;;  %v4664_v45 = vpack.c.bf16 %v64_v43, %v63_v42  ;;  %v62_v47 = vld [vmem:[%s5481_s3 + $0x58] sm:$0xff]  ;;  %v65_v48 = vld [vmem:[%s5481_s3 + $0x70] sm:$0xff]  ;;  %v67_v52 = vld [vmem:[%s5482_s4] sm:$0xff] }
  0x14   :  { %4225 = vmatmul.mubr.msk.f32.vlgmr.msra.gmra.mrb[2].mxu1 %vm87_vm1, %v4965_v18  ;;  %4623 = vmatpush3.bf16.msra.mxu0 %v4598_v4  ;;  %v66_v49 = vld [vmem:[%s5481_s3 + $0x78] sm:$0xff]  ;;  %v4661_v50 = vpack.c.bf16 %v62_v47, %v61_v46  ;;  %v68_v53 = vld [vmem:[%s5482_s4 + $0x8] sm:$0xff]  ;;  %v69_v55 = vld [vmem:[%s5482_s4 + $0x10] sm:$0xff] }
  0x15   :  { %4629 = vmatpush3.bf16.msra.mxu1 %v4604_v8  ;;  %4624 = vmatprep.subr.bf16.mxu0 %v4861_v3  ;;  %v4667_v51 = vpack.c.bf16 %v66_v49, %v65_v48  ;;  %v4694_v54 = vpack.c.bf16 %v68_v53, %v67_v52  ;;  %v70_v56 = vld [vmem:[%s5482_s4 + $0x18] sm:$0xff]  ;;  %v71_v58 = vld [vmem:[%s5482_s4 + $0x20] sm:$0xff]  ;;  %v72_v59 = vld [vmem:[%s5482_s4 + $0x28] sm:$0xff] }
  0x16   :  { %4630 = vmatprep.subr.bf16.mxu1 %v4861_v3  ;;  %4235 = vmatprep.mubr.msk.f32.mxu0 %vm4862_vm0, %v4863_v11  ;;  %v4697_v57 = vpack.c.bf16 %v70_v56, %v69_v55  ;;  %v75_v60 = vld [vmem:[%s5482_s4 + $0x40] sm:$0xff]  ;;  %v4700_v61 = vpack.c.bf16 %v72_v59, %v71_v58  ;;  %v76_v62 = vld [vmem:[%s5482_s4 + $0x48] sm:$0xff]  ;;  %v73_v0 = vld [vmem:[%s5482_s4 + $0x30] sm:$0xff] }
  0x17   :  { %4246 = vmatprep.mubr.msk.f32.mxu1 %vm4862_vm0, %v4863_v11  ;;  %v4706_v63 = vpack.c.bf16 %v76_v62, %v75_v60  ;;  %v74_v1 = vld [vmem:[%s5482_s4 + $0x38] sm:$0xff]  ;;  %v77_v2 = vld [vmem:[%s5482_s4 + $0x50] sm:$0xff]  ;;  %v79_v7 = vld [vmem:[%s5482_s4 + $0x60] sm:$0xff] }
  0x18   :  { %4626 = vmatpush3.bf16.msra.mxu0 %v4601_v12  ;;  %v4703_v4 = vpack.c.bf16 %v74_v1, %v73_v0  ;;  %v78_v5 = vld [vmem:[%s5482_s4 + $0x58] sm:$0xff]  ;;  %v80_v8 = vld [vmem:[%s5482_s4 + $0x68] sm:$0xff]  ;;  %v81_v10 = vld [vmem:[%s5482_s4 + $0x70] sm:$0xff] }
  0x19   :  { %4632 = vmatpush3.bf16.msra.mxu1 %v4607_v13  ;;  %4633 = vmatprep.subr.bf16.mxu0 %v4861_v3  ;;  %v4709_v6 = vpack.c.bf16 %v78_v5, %v77_v2  ;;  %v4712_v9 = vpack.c.bf16 %v80_v8, %v79_v7  ;;  %v82_v12 = vld [vmem:[%s5482_s4 + $0x78] sm:$0xff]  ;;  %v2391_v7 = vld [vmem:[%s5479_s1] sm:$0xff] }
  0x1a   :  { %4639 = vmatprep.subr.bf16.mxu1 %v4861_v3  ;;  %v4715_v13 = vpack.c.bf16 %v82_v12, %v81_v10  ;;  %vm2393_vm3 = vcmp.gt.f32.partialorder %v2391_v7, 0.5 }
  0x1b   :  { %4236 = vmatmul.mubr.msk.f32.vlgmr.msra.gmra.mrb[4].mxu0 %vm87_vm1, %v5006_v27 }
  0x1c   :  { %4247 = vmatmul.mubr.msk.f32.vlgmr.msra.gmra.mrb[4].mxu1 %vm87_vm1, %v5006_v27  ;;  %4635 = vmatpush3.bf16.msra.mxu0 %v4610_v19 }
  0x1d   :  { %4641 = vmatpush3.bf16.msra.mxu1 %v4616_v20  ;;  %4636 = vmatprep.subr.bf16.mxu0 %v4861_v3 }
  0x1e   :  { %4642 = vmatprep.subr.bf16.mxu1 %v4861_v3  ;;  %4257 = vmatprep.mubr.msk.f32.mxu0 %vm4862_vm0, %v4863_v11 }
  0x1f   :  { %4268 = vmatprep.mubr.msk.f32.mxu1 %vm4862_vm0, %v4863_v11 }
  0x20   :  { %4638 = vmatpush3.bf16.msra.mxu0 %v4613_v25 }
  0x21   :  { %4644 = vmatpush3.bf16.msra.mxu1 %v4619_v26  ;;  %4645 = vmatprep.subr.bf16.mxu0 %v4861_v3 }
  0x22   :  { %4651 = vmatprep.subr.bf16.mxu1 %v4861_v3 }
  0x23   :  { %4258 = vmatmul.mubr.msk.f32.vlgmr.msra.gmra.mrb[6].mxu0 %vm87_vm1, %v5006_v27 }
  0x24   :  { %4269 = vmatmul.mubr.msk.f32.vlgmr.msra.gmra.mrb[6].mxu1 %vm87_vm1, %v5006_v27  ;;  %4647 = vmatpush3.bf16.msra.mxu0 %v4646_v32 }
  0x25   :  { %4653 = vmatpush3.bf16.msra.mxu1 %v4652_v33  ;;  %4648 = vmatprep.subr.bf16.mxu0 %v4861_v3 }
  0x26   :  { %4654 = vmatprep.subr.bf16.mxu1 %v4861_v3  ;;  %4279 = vmatprep.mubr.msk.f32.mxu0 %vm4862_vm0, %v4863_v11 }
  0x27   :  { %4290 = vmatprep.mubr.msk.f32.mxu1 %vm4862_vm0, %v4863_v11 }
  0x28   :  { %4650 = vmatpush3.bf16.msra.mxu0 %v4649_v38 }
  0x29   :  { %4656 = vmatpush3.bf16.msra.mxu1 %v4655_v39  ;;  %4657 = vmatprep.subr.bf16.mxu0 %v4861_v3 }
  0x2a   :  { %4663 = vmatprep.subr.bf16.mxu1 %v4861_v3 }
  0x2b   :  { %4280 = vmatmul.mubr.msk.f32.vlgmr.msra.gmra.mrb[8].mxu0 %vm87_vm1, %v4965_v18 }
  0x2c   :  { %4291 = vmatmul.mubr.msk.f32.vlgmr.msra.gmra.mrb[8].mxu1 %vm87_vm1, %v4965_v18  ;;  %4659 = vmatpush3.bf16.msra.mxu0 %v4658_v44 }
  0x2d   :  { %4665 = vmatpush3.bf16.msra.mxu1 %v4664_v45  ;;  %4660 = vmatprep.subr.bf16.mxu0 %v4861_v3 }
  0x2e   :  { %4666 = vmatprep.subr.bf16.mxu1 %v4861_v3  ;;  %4301 = vmatprep.mubr.msk.f32.mxu0 %vm4862_vm0, %v4863_v11 }
  0x2f   :  { %4312 = vmatprep.mubr.msk.f32.mxu1 %vm4862_vm0, %v4863_v11 }
  0x30   :  { %4662 = vmatpush3.bf16.msra.mxu0 %v4661_v50 }
  0x31   :  { %4668 = vmatpush3.bf16.msra.mxu1 %v4667_v51  ;;  %4669 = vmatprep.subr.bf16.mxu0 %v4861_v3 }
  0x32   :  { %4675 = vmatprep.subr.bf16.mxu1 %v4861_v3 }
  0x33   :  { %4302 = vmatmul.mubr.msk.f32.vlgmr.msra.gmra.mrb[10].mxu0 %vm87_vm1, %v4965_v18 }
  0x34   :  { %4313 = vmatmul.mubr.msk.f32.vlgmr.msra.gmra.mrb[10].mxu1 %vm87_vm1, %v4965_v18  ;;  %4671 = vmatpush3.bf16.msra.mxu0 %v4646_v32 }
  0x35   :  { %4677 = vmatpush3.bf16.msra.mxu1 %v4652_v33  ;;  %4672 = vmatprep.subr.bf16.mxu0 %v4861_v3 }
  0x36   :  { %4678 = vmatprep.subr.bf16.mxu1 %v4861_v3  ;;  %4323 = vmatprep.mubr.msk.f32.mxu0 %vm4862_vm0, %v4863_v11 }
  0x37   :  { %4334 = vmatprep.mubr.msk.f32.mxu1 %vm4862_vm0, %v4863_v11 }
  0x38   :  { %4674 = vmatpush3.bf16.msra.mxu0 %v4649_v38 }
  0x39   :  { %4680 = vmatpush3.bf16.msra.mxu1 %v4655_v39  ;;  %4681 = vmatprep.subr.bf16.mxu0 %v4861_v3 }
  0x3a   :  { %4687 = vmatprep.subr.bf16.mxu1 %v4861_v3 }
  0x3b   :  { %4324 = vmatmul.mubr.msk.f32.vlgmr.msra.gmra.mrb[12].mxu0 %vm87_vm1, %v5006_v27 }
  0x3c   :  { %4335 = vmatmul.mubr.msk.f32.vlgmr.msra.gmra.mrb[12].mxu1 %vm87_vm1, %v5006_v27  ;;  %4683 = vmatpush3.bf16.msra.mxu0 %v4658_v44 }
  0x3d   :  { %4689 = vmatpush3.bf16.msra.mxu1 %v4664_v45  ;;  %4684 = vmatprep.subr.bf16.mxu0 %v4861_v3 }
  0x3e   :  { %4690 = vmatprep.subr.bf16.mxu1 %v4861_v3  ;;  %4345 = vmatprep.mubr.msk.f32.mxu0 %vm4862_vm0, %v4863_v11 }
  0x3f   :  { %4356 = vmatprep.mubr.msk.f32.mxu1 %vm4862_vm0, %v4863_v11 }
  0x40   :  { %4686 = vmatpush3.bf16.msra.mxu0 %v4661_v50 }
  0x41   :  { %4692 = vmatpush3.bf16.msra.mxu1 %v4667_v51  ;;  %4693 = vmatprep.subr.bf16.mxu0 %v4861_v3 }
  0x42   :  { %4699 = vmatprep.subr.bf16.mxu1 %v4861_v3 }
  0x43   :  { %4346 = vmatmul.mubr.msk.f32.vlgmr.msra.gmra.mrb[14].mxu0 %vm87_vm1, %v5006_v27 }
  0x44   :  { %4357 = vmatmul.mubr.msk.f32.vlgmr.msra.gmra.mrb[14].mxu1 %vm87_vm1, %v5006_v27  ;;  %4695 = vmatpush3.bf16.msra.mxu0 %v4694_v54 }
  0x45   :  { %4696 = vmatprep.subr.bf16.mxu0 %v4861_v3  ;;  %4367 = vmatprep.mubr.msk.f32.mxu0 %vm4862_vm0, %v4863_v11 }
  0x46   :  { %4378 = vmatprep.mubr.msk.f32.mxu1 %vm4862_vm0, %v4863_v11  ;;  %4701 = vmatpush3.bf16.msra.mxu1 %v4700_v61 }
  0x47   :  { %4702 = vmatprep.subr.bf16.mxu1 %v4861_v3 }
  0x48   :  { %4698 = vmatpush3.bf16.msra.mxu0 %v4697_v57 }
  0x49   :  { %4705 = vmatprep.subr.bf16.mxu0 %v4861_v3 }
  0x4a   :  { %4704 = vmatpush3.bf16.msra.mxu1 %v4703_v4 }
  0x4b   :  { %4368 = vmatmul.mubr.msk.f32.vlgmr.msra.gmra.mrb[16].mxu0 %vm87_vm1, %v4965_v18  ;;  %4711 = vmatprep.subr.bf16.mxu1 %v4861_v3 }
  0x4c   :  { %4389 = vmatprep.mubr.msk.f32.mxu0 %vm4862_vm0, %v4863_v11  ;;  %4707 = vmatpush3.bf16.msra.mxu0 %v4706_v63 }
  0x4d   :  { %4708 = vmatprep.subr.bf16.mxu0 %v4861_v3  ;;  %4379 = vmatmul.mubr.msk.f32.vlgmr.msra.gmra.mrb[16].mxu1 %vm87_vm1, %v4965_v18 }
  0x4e   :  { %4713 = vmatpush3.bf16.msra.mxu1 %v4712_v9  ;;  %4400 = vmatprep.mubr.msk.f32.mxu1 %vm4862_vm0, %v4863_v11 }
  0x4f   :  { %4714 = vmatprep.subr.bf16.mxu1 %v4861_v3 }
  0x50   :  { %4710 = vmatpush3.bf16.msra.mxu0 %v4709_v6 }
  0x51   :  { %4717 = vmatprep.subr.bf16.mxu0 %v4861_v3 }
  0x52   :  { %4716 = vmatpush3.bf16.msra.mxu1 %v4715_v13 }
  0x53   :  { %4390 = vmatmul.mubr.msk.f32.vlgmr.msra.gmra.mrb[18].mxu0 %vm87_vm1, %v4965_v18  ;;  %4723 = vmatprep.subr.bf16.mxu1 %v4861_v3 }
  0x54   :  { %4719 = vmatpush3.bf16.msra.mxu0 %v4694_v54  ;;  %4411 = vmatprep.mubr.msk.f32.mxu0 %vm4862_vm0, %v4863_v11 }
  0x55   :  { %4720 = vmatprep.subr.bf16.mxu0 %v4861_v3  ;;  %4401 = vmatmul.mubr.msk.f32.vlgmr.msra.gmra.mrb[18].mxu1 %vm87_vm1, %v4965_v18 }
  0x56   :  { %4725 = vmatpush3.bf16.msra.mxu1 %v4700_v61  ;;  %4422 = vmatprep.mubr.msk.f32.mxu1 %vm4862_vm0, %v4863_v11 }
  0x57   :  { %4726 = vmatprep.subr.bf16.mxu1 %v4861_v3 }
  0x58   :  { %4722 = vmatpush3.bf16.msra.mxu0 %v4697_v57 }
  0x59   :  { %4729 = vmatprep.subr.bf16.mxu0 %v4861_v3 }
  0x5a   :  { %4728 = vmatpush3.bf16.msra.mxu1 %v4703_v4 }
  0x5b   :  { %4412 = vmatmul.mubr.msk.f32.vlgmr.msra.gmra.mrb[20].mxu0 %vm87_vm1, %v5006_v27  ;;  %4735 = vmatprep.subr.bf16.mxu1 %v4861_v3 }
  0x5c   :  { %4731 = vmatpush3.bf16.msra.mxu0 %v4706_v63  ;;  %4433 = vmatprep.mubr.msk.f32.mxu0 %vm4862_vm0, %v4863_v11 }
  0x5d   :  { %4732 = vmatprep.subr.bf16.mxu0 %v4861_v3  ;;  %4423 = vmatmul.mubr.msk.f32.vlgmr.msra.gmra.mrb[20].mxu1 %vm87_vm1, %v5006_v27 }
  0x5e   :  { %4737 = vmatpush3.bf16.msra.mxu1 %v4712_v9  ;;  %4444 = vmatprep.mubr.msk.f32.mxu1 %vm4862_vm0, %v4863_v11 }
  0x5f   :  { %4738 = vmatprep.subr.bf16.mxu1 %v4861_v3 }
  0x60   :  { %4734 = vmatpush3.bf16.msra.mxu0 %v4709_v6 }
  0x61   :  { %4447 = vmatprep.subr.mxu0 %v4863_v11 }
  0x62   :  { %4740 = vmatpush3.bf16.msra.mxu1 %v4715_v13 }
  0x63   :  { %4434 = vmatmul.mubr.msk.f32.vlgmr.msra.gmra.mrb[22].mxu0 %vm87_vm1, %v5006_v27  ;;  %4462 = vmatprep.subr.mxu1 %v4863_v11 }
  0x64   :  { %4449 = vmatprep.mubr.msk.f32.mxu0 %vm4862_vm0, %v4863_v11 }
  0x65   :  { %4445 = vmatmul.mubr.msk.f32.vlgmr.msra.gmra.mrb[22].mxu1 %vm87_vm1, %v5006_v27 }
  0x66   :  { %4464 = vmatprep.mubr.msk.f32.mxu1 %vm4862_vm0, %v4863_v11 }
  0xde   :  { %v157_v14 = vpop.f32.mrb[0].mxu0 }
  0xdf   :  { %v4193_v15 = vpop.f32.mrb[1].mxu0  ;;  %v227_v16 = vpop.f32.mrb[0].mxu1  ;;  %v654_v33 = vmul.f32 0.35355338, %v157_v14 }
  0xe0   :  { %v4204_v17 = vpop.f32.mrb[1].mxu1  ;;  %v655_v35 = vmul.f32 0.35355338, %v227_v16 }
  0xe6   :  { %v297_v3 = vpop.f32.mrb[2].mxu0 }
  0xe7   :  { %v4215_v18 = vpop.f32.mrb[3].mxu0  ;;  %v367_v19 = vpop.f32.mrb[2].mxu1  ;;  %v656_v39 = vmul.f32 0.35355338, %v297_v3 }
  0xe8   :  { %v4226_v20 = vpop.f32.mrb[3].mxu1  ;;  %v657_v41 = vmul.f32 0.35355338, %v367_v19 }
  0xee   :  { %v440_v21 = vpop.f32.mrb[4].mxu0 }
  0xef   :  { %v4237_v22 = vpop.f32.mrb[5].mxu0  ;;  %v510_v23 = vpop.f32.mrb[4].mxu1  ;;  %v658_v45 = vmul.f32 0.35355338, %v440_v21 }
  0xf0   :  { %v4248_v24 = vpop.f32.mrb[5].mxu1  ;;  %v659_v47 = vmul.f32 0.35355338, %v510_v23  ;;  %v2392_v23 = vld [vmem:[%s5479_s1 + $0x8] sm:$0xff] }
  0xf1   :  { %vm2394_vm4 = vcmp.gt.f32.partialorder %v2392_v23, 0.5 }
  0xf6   :  { %v580_v25 = vpop.f32.mrb[6].mxu0 }
  0xf7   :  { %v4259_v26 = vpop.f32.mrb[7].mxu0  ;;  %v650_v28 = vpop.f32.mrb[6].mxu1  ;;  %v660_v51 = vmul.f32 0.35355338, %v580_v25 }
  0xf8   :  { %v4270_v29 = vpop.f32.mrb[7].mxu1  ;;  %v661_v53 = vmul.f32 0.35355338, %v650_v28 }
  0xfe   :  { %v728_v30 = vpop.f32.mrb[8].mxu0 }
  0xff   :  { %v4281_v31 = vpop.f32.mrb[9].mxu0  ;;  %4448 = vmatpush3.xpose.msk.msra.mxu0 %vm1782_vm2, %v728_v30  ;;  %v798_v32 = vpop.f32.mrb[8].mxu1 }
 0x100   :  { %v4292_v34 = vpop.f32.mrb[9].mxu1  ;;  %4452 = vmatprep.subr.mxu0 %v4863_v11 }
 0x102   :  { %4450 = vmatmul.mubr.msk.f32.vlgmr.msra.gmra.mrb[24].mxu0 %vm1782_vm2, %v654_v33 }
 0x103   :  { %4453 = vmatpush3.xpose.msk.msra.mxu0 %vm1782_vm2, %v798_v32  ;;  %4454 = vmatprep.mubr.msk.f32.mxu0 %vm4862_vm0, %v4863_v11 }
 0x104   :  { %4457 = vmatprep.subr.mxu0 %v4863_v11 }
 0x106   :  { %v868_v36 = vpop.f32.mrb[10].mxu0  ;;  %4455 = vmatmul.mubr.msk.f32.vlgmr.msra.gmra.mrb[26].mxu0 %vm1782_vm2, %v655_v35 }
 0x107   :  { %v938_v37 = vpop.f32.mrb[10].mxu1  ;;  %v4303_v38 = vpop.f32.mrb[11].mxu0  ;;  %4458 = vmatpush3.xpose.msk.msra.mxu0 %vm1782_vm2, %v868_v36  ;;  %4459 = vmatprep.mubr.msk.f32.mxu0 %vm4862_vm0, %v4863_v11 }
 0x108   :  { %4463 = vmatpush3.xpose.msk.msra.mxu1 %vm1782_vm2, %v938_v37  ;;  %v4314_v40 = vpop.f32.mrb[11].mxu1  ;;  %4467 = vmatprep.subr.mxu0 %v4863_v11 }
 0x109   :  { %4472 = vmatprep.subr.mxu1 %v4863_v11 }
 0x10a   :  { %4460 = vmatmul.mubr.msk.f32.vlgmr.msra.gmra.mrb[28].mxu0 %vm1782_vm2, %v656_v39 }
 0x10b   :  { %4465 = vmatmul.mubr.msk.f32.vlgmr.msra.gmra.mrb[24].mxu1 %vm1782_vm2, %v657_v41  ;;  %4469 = vmatprep.mubr.msk.f32.mxu0 %vm4862_vm0, %v4863_v11 }
 0x10c   :  { %4474 = vmatprep.mubr.msk.f32.mxu1 %vm4862_vm0, %v4863_v11 }
 0x10e   :  { %v1008_v42 = vpop.f32.mrb[12].mxu0 }
 0x10f   :  { %v1078_v43 = vpop.f32.mrb[12].mxu1  ;;  %v4325_v44 = vpop.f32.mrb[13].mxu0  ;;  %4468 = vmatpush3.xpose.msk.msra.mxu0 %vm1782_vm2, %v1008_v42 }
 0x110   :  { %4473 = vmatpush3.xpose.msk.msra.mxu1 %vm1782_vm2, %v1078_v43  ;;  %v4336_v46 = vpop.f32.mrb[13].mxu1  ;;  %4477 = vmatprep.subr.mxu0 %v4863_v11 }
 0x111   :  { %4482 = vmatprep.subr.mxu1 %v4863_v11 }
 0x112   :  { %4470 = vmatmul.mubr.msk.f32.vlgmr.msra.gmra.mrb[30].mxu0 %vm1782_vm2, %v658_v45 }
 0x113   :  { %4475 = vmatmul.mubr.msk.f32.vlgmr.msra.gmra.mrb[26].mxu1 %vm1782_vm2, %v659_v47  ;;  %4479 = vmatprep.mubr.msk.f32.mxu0 %vm4862_vm0, %v4863_v11 }
 0x114   :  { %4484 = vmatprep.mubr.msk.f32.mxu1 %vm4862_vm0, %v4863_v11 }
 0x116   :  { %v1148_v48 = vpop.f32.mrb[14].mxu0 }
 0x117   :  { %v1218_v49 = vpop.f32.mrb[14].mxu1  ;;  %v4347_v50 = vpop.f32.mrb[15].mxu0  ;;  %4478 = vmatpush3.xpose.msk.msra.mxu0 %vm1782_vm2, %v1148_v48 }
 0x118   :  { %4483 = vmatpush3.xpose.msk.msra.mxu1 %vm1782_vm2, %v1218_v49  ;;  %v4358_v52 = vpop.f32.mrb[15].mxu1  ;;  %4487 = vmatprep.subr.mxu0 %v4863_v11 }
 0x119   :  { %4492 = vmatprep.subr.mxu1 %v4863_v11 }
 0x11a   :  { %4480 = vmatmul.mubr.msk.f32.vlgmr.msra.gmra.mrb[32].mxu0 %vm1782_vm2, %v660_v51 }
 0x11b   :  { %4485 = vmatmul.mubr.msk.f32.vlgmr.msra.gmra.mrb[28].mxu1 %vm1782_vm2, %v661_v53  ;;  %4489 = vmatprep.mubr.msk.f32.mxu0 %vm4862_vm0, %v4863_v11 }
 0x11c   :  { %4494 = vmatprep.mubr.msk.f32.mxu1 %vm4862_vm0, %v4863_v11 }
 0x11e   :  { %v1288_v54 = vpop.f32.mrb[16].mxu0 }
 0x11f   :  { %v4369_v55 = vpop.f32.mrb[17].mxu0  ;;  %4488 = vmatpush3.msra.mxu0 %v1288_v54 }
 0x120   :  { %4497 = vmatprep.subr.mxu0 %v4863_v11  ;;  %v1358_v56 = vpop.f32.mrb[16].mxu1 }
 0x121   :  { %v4380_v58 = vpop.f32.mrb[17].mxu1  ;;  %4493 = vmatpush3.msra.mxu1 %v1358_v56 }
 0x122   :  { %4502 = vmatprep.subr.mxu1 %v4863_v11 }
 0x126   :  { %v5263_v57 = vpop.f32.mrb[18].mxu0 }
 0x127   :  { %v4391_v59 = vpop.f32.mrb[19].mxu0 }
 0x128   :  { %v5266_v60 = vpop.f32.mrb[18].mxu1 }
 0x129   :  { %v4402_v62 = vpop.f32.mrb[19].mxu1 }
 0x12e   :  { %v5268_v61 = vpop.f32.mrb[20].mxu0 }
 0x12f   :  { %v4413_v63 = vpop.f32.mrb[21].mxu0 }
 0x130   :  { %v5272_v2 = vpop.f32.mrb[20].mxu1 }
 0x131   :  { %v4424_v4 = vpop.f32.mrb[21].mxu1 }
 0x136   :  { %v5270_v0 = vpop.f32.mrb[22].mxu0 }
 0x137   :  { %v4435_v1 = vpop.f32.mrb[23].mxu0 }
 0x138   :  { %v5274_v5 = vpop.f32.mrb[22].mxu1 }
 0x139   :  { %v4446_v6 = vpop.f32.mrb[23].mxu1 }
 0x1d5   :  { %v1855_v8 = vpop.f32.mrb[24].mxu0 }
 0x1d6   :  { %v2395_v9 = vsel %vm2393_vm3, -1e+09, %v1855_v8  ;;  %v4451_v10 = vpop.f32.mrb[25].mxu0 }
 0x1d7   :  { %v2403_v12 = vsel %vm1782_vm2, %v2395_v9, -inf }
 0x1d8   :  { %2404 = vmax.xlane.f32.xlu0 %v2403_v12 }
 0x1d9   :  { %v1931_v13 = vpop.f32.mrb[26].mxu0 }
 0x1da   :  { %v2396_v14 = vsel %vm2393_vm3, -1e+09, %v1931_v13  ;;  %v4456_v15 = vpop.f32.mrb[27].mxu0 }
 0x1db   :  { %v2406_v16 = vsel %vm1782_vm2, %v2396_v14, -inf }
 0x1dc   :  { %2407 = vmax.xlane.f32.xlu0 %v2406_v16 }
 0x1dd   :  { %v2007_v17 = vpop.f32.mrb[28].mxu0 }
 0x1de   :  { %v2397_v3 = vsel %vm2393_vm3, -1e+09, %v2007_v17  ;;  %v2083_v18 = vpop.f32.mrb[24].mxu1  ;;  %v4461_v19 = vpop.f32.mrb[29].mxu0 }
 0x1df   :  { %v4466_v20 = vpop.f32.mrb[25].mxu1  ;;  %v2409_v21 = vsel %vm1782_vm2, %v2397_v3, -inf  ;;  %v2398_v22 = vsel %vm2393_vm3, -1e+09, %v2083_v18 }
 0x1e0   :  { %2410 = vmax.xlane.f32.xlu1 %v2409_v21  ;;  %v2412_v24 = vsel %vm1782_vm2, %v2398_v22, -inf }
 0x1e4   :  { %2413 = vmax.xlane.f32.xlu1 %v2412_v24 }
 0x1e5   :  { %v2159_v25 = vpop.f32.mrb[30].mxu0 }
 0x1e6   :  { %v2399_v26 = vsel %vm2394_vm4, -1e+09, %v2159_v25  ;;  %v2235_v28 = vpop.f32.mrb[26].mxu1  ;;  %v4471_v29 = vpop.f32.mrb[31].mxu0 }
 0x1e7   :  { %v2400_v30 = vsel %vm2394_vm4, -1e+09, %v2235_v28  ;;  %v4476_v31 = vpop.f32.mrb[27].mxu1  ;;  %v2415_v32 = vsel %vm1782_vm2, %v2399_v26, -inf }
 0x1e8   :  { %v2418_v33 = vsel %vm1782_vm2, %v2400_v30, -inf  ;;  %2416 = vmax.xlane.f32.xlu0 %v2415_v32 }
 0x1e9   :  { %2419 = vmax.xlane.f32.xlu1 %v2418_v33 }
 0x1ed   :  { %v2311_v34 = vpop.f32.mrb[32].mxu0 }
 0x1ee   :  { %v2401_v35 = vsel %vm2394_vm4, -1e+09, %v2311_v34  ;;  %v2387_v36 = vpop.f32.mrb[28].mxu1  ;;  %v4481_v37 = vpop.f32.mrb[33].mxu0 }
 0x1ef   :  { %v2402_v38 = vsel %vm2394_vm4, -1e+09, %v2387_v36  ;;  %v4486_v39 = vpop.f32.mrb[29].mxu1  ;;  %v2421_v40 = vsel %vm1782_vm2, %v2401_v35, -inf }
 0x1f0   :  { %v2424_v41 = vsel %vm1782_vm2, %v2402_v38, -inf  ;;  %2422 = vmax.xlane.f32.xlu0 %v2421_v40 }
 0x1f1   :  { %2425 = vmax.xlane.f32.xlu1 %v2424_v41 }
 0x265   :  { %v2405_v42 = vpop.xlane.xlu0 %2404 }
 0x266   :  { %v2427_v43 = vsub.f32 %v2395_v9, %v2405_v42 }
 0x268   :  { %v2435_v44 = vmul.f32 1.442695, %v2427_v43 }
 0x269   :  { %v2408_v45 = vpop.xlane.xlu0 %2407 }
 0x26a   :  { %4772 = vpow2.f32 %v2435_v44  ;;  %v2428_v46 = vsub.f32 %v2396_v14, %v2408_v45 }
 0x26c   :  { %v2437_v47 = vmul.f32 1.442695, %v2428_v46  ;;  %v85_v46 = vld [vmem:[%s5483_s5 + $0x10] sm:$0xff] }
 0x26d   :  { %v2411_v48 = vpop.xlane.xlu1 %2410 }
 0x26e   :  { %4774 = vpow2.f32 %v2437_v47  ;;  %v2429_v49 = vsub.f32 %v2397_v3, %v2411_v48 }
 0x270   :  { %v2439_v50 = vmul.f32 1.442695, %v2429_v49  ;;  %v86_v49 = vld [vmem:[%s5483_s5 + $0x18] sm:$0xff] }
 0x271   :  { %v2414_v51 = vpop.xlane.xlu1 %2413 }
 0x272   :  { %4776 = vpow2.f32 %v2439_v50  ;;  %v2430_v52 = vsub.f32 %v2398_v22, %v2414_v51 }
 0x274   :  { %v4773_v53 = vpop.eup %4772  ;;  %v2441_v54 = vmul.f32 1.442695, %v2430_v52 }
 0x275   :  { %v2417_v55 = vpop.xlane.xlu0 %2416  ;;  %v2451_v56 = vsel %vm1782_vm2, %v4773_v53, 0.0 }
 0x276   :  { %4778 = vpow2.f32 %v2441_v54  ;;  %v2420_v58 = vpop.xlane.xlu1 %2419  ;;  %v2431_v59 = vsub.f32 %v2399_v26, %v2417_v55  ;;  %2452 = vadd.xlane.f32.xlu0 %v2451_v56 }
 0x277   :  { %v2432_v62 = vsub.f32 %v2400_v30, %v2420_v58 }
 0x278   :  { %v4775_v63 = vpop.eup %4774  ;;  %v2443_v1 = vmul.f32 1.442695, %v2431_v59 }
 0x279   :  { %v2445_v4 = vmul.f32 1.442695, %v2432_v62  ;;  %v2454_v6 = vsel %vm1782_vm2, %v4775_v63, 0.0 }
 0x27a   :  { %4780 = vpow2.f32 %v2443_v1  ;;  %2455 = vadd.xlane.f32.xlu1 %v2454_v6 }
 0x27b   :  { %4782 = vpow2.f32 %v2445_v4 }
 0x27c   :  { %v4777_v7 = vpop.eup %4776 }
 0x27d   :  { %v2423_v8 = vpop.xlane.xlu0 %2422  ;;  %v2457_v9 = vsel %vm1782_vm2, %v4777_v7, 0.0 }
 0x27e   :  { %v2426_v10 = vpop.xlane.xlu1 %2425  ;;  %v2433_v12 = vsub.f32 %v2401_v35, %v2423_v8  ;;  %2458 = vadd.xlane.f32.xlu0 %v2457_v9 }
 0x27f   :  { %v2434_v13 = vsub.f32 %v2402_v38, %v2426_v10 }
 0x280   :  { %v4779_v14 = vpop.eup %4778  ;;  %v2447_v15 = vmul.f32 1.442695, %v2433_v12 }
 0x281   :  { %v2449_v16 = vmul.f32 1.442695, %v2434_v13  ;;  %v2460_v17 = vsel %vm1782_vm2, %v4779_v14, 0.0 }
 0x282   :  { %4784 = vpow2.f32 %v2447_v15  ;;  %2461 = vadd.xlane.f32.xlu1 %v2460_v17 }
 0x283   :  { %4786 = vpow2.f32 %v2449_v16 }
 0x284   :  { %v4781_v3 = vpop.eup %4780 }
 0x285   :  { %v4783_v18 = vpop.eup %4782  ;;  %v2463_v19 = vsel %vm1782_vm2, %v4781_v3, 0.0 }
 0x286   :  { %v2466_v20 = vsel %vm1782_vm2, %v4783_v18, 0.0  ;;  %2464 = vadd.xlane.f32.xlu0 %v2463_v19 }
 0x287   :  { %2467 = vadd.xlane.f32.xlu1 %v2466_v20 }
 0x28c   :  { %v5304_v21 = vpop.eup %4784 }
 0x28d   :  { %v5306_v22 = vpop.eup %4786  ;;  %v2469_v23 = vsel %vm1782_vm2, %v5304_v21, 0.0 }
 0x28e   :  { %v2472_v24 = vsel %vm1782_vm2, %v5306_v22, 0.0  ;;  %2470 = vadd.xlane.f32.xlu0 %v2469_v23 }
 0x28f   :  { %2473 = vadd.xlane.f32.xlu1 %v2472_v24 }
 0x303   :  { %v2453_v25 = vpop.xlane.xlu0 %2452 }
 0x304   :  { %4788 = vrcp.f32 %v2453_v25 }
 0x307   :  { %v2456_v26 = vpop.xlane.xlu1 %2455 }
 0x308   :  { %4790 = vrcp.f32 %v2456_v26 }
 0x30b   :  { %v2459_v28 = vpop.xlane.xlu0 %2458 }
 0x30c   :  { %4792 = vrcp.f32 %v2459_v28 }
 0x30e   :  { %v4789_v29 = vpop.eup %4788 }
 0x30f   :  { %v2483_v30 = vmul.f32 %v4789_v29, %v4773_v53  ;;  %v2462_v31 = vpop.xlane.xlu1 %2461 }
 0x310   :  { %4794 = vrcp.f32 %v2462_v31 }
 0x311   :  { %2491 = vst.msk [vmem:[#allocation4] sm:$0xff] %vm1782_vm2, %v2483_v30  ;;  %4490 = vmatmul.mubr.msk.f32.vlgmr.msra.gmra.mrb[34].mxu0 %vm1782_vm2, %v2483_v30 }
 0x312   :  { %v4791_v32 = vpop.eup %4790  ;;  %4498 = vmatpush3.msra.mxu0 %v5263_v57  ;;  %4499 = vmatprep.mubr.msk.f32.mxu0 %vm4862_vm0, %v4863_v11 }
 0x313   :  { %v2484_v33 = vmul.f32 %v4791_v32, %v4775_v63  ;;  %v2465_v34 = vpop.xlane.xlu0 %2464  ;;  %4507 = vmatprep.subr.mxu0 %v4863_v11 }
 0x314   :  { %v2468_v35 = vpop.xlane.xlu1 %2467  ;;  %4796 = vrcp.f32 %v2465_v34 }
 0x315   :  { %2492 = vst.msk [vmem:[#allocation4 + $0x8] sm:$0xff] %vm1782_vm2, %v2484_v33  ;;  %4798 = vrcp.f32 %v2468_v35  ;;  %4495 = vmatmul.mubr.msk.f32.vlgmr.msra.gmra.mrb[30].mxu1 %vm1782_vm2, %v2484_v33 }
 0x316   :  { %v4793_v36 = vpop.eup %4792  ;;  %4503 = vmatpush3.msra.mxu1 %v5266_v60  ;;  %4504 = vmatprep.mubr.msk.f32.mxu1 %vm4862_vm0, %v4863_v11 }
 0x317   :  { %v2485_v57 = vmul.f32 %v4793_v36, %v4777_v7  ;;  %4512 = vmatprep.subr.mxu1 %v4863_v11 }
 0x319   :  { %2493 = vst.msk [vmem:[#allocation4 + $0x10] sm:$0xff] %vm1782_vm2, %v2485_v57  ;;  %4500 = vmatmul.mubr.msk.f32.vlgmr.msra.gmra.mrb[36].mxu0 %vm1782_vm2, %v2485_v57 }
 0x31a   :  { %v4795_v37 = vpop.eup %4794  ;;  %4508 = vmatpush3.msra.mxu0 %v5268_v61  ;;  %4509 = vmatprep.mubr.msk.f32.mxu0 %vm4862_vm0, %v4863_v11 }
 0x31b   :  { %v2486_v38 = vmul.f32 %v4795_v37, %v4779_v14  ;;  %v2471_v39 = vpop.xlane.xlu0 %2470  ;;  %4517 = vmatprep.subr.mxu0 %v4863_v11 }
 0x31c   :  { %v2474_v60 = vpop.xlane.xlu1 %2473  ;;  %4800 = vrcp.f32 %v2471_v39 }
 0x31d   :  { %2494 = vst.msk [vmem:[#allocation4 + $0x18] sm:$0xff] %vm1782_vm2, %v2486_v38  ;;  %4802 = vrcp.f32 %v2474_v60  ;;  %4505 = vmatmul.mubr.msk.f32.vlgmr.msra.gmra.mrb[32].mxu1 %vm1782_vm2, %v2486_v38 }
 0x31e   :  { %v4797_v40 = vpop.eup %4796  ;;  %4513 = vmatpush3.msra.mxu1 %v5272_v2  ;;  %4514 = vmatprep.mubr.msk.f32.mxu1 %vm4862_vm0, %v4863_v11 }
 0x31f   :  { %v4799_v61 = vpop.eup %4798  ;;  %v2487_v41 = vmul.f32 %v4797_v40, %v4781_v3  ;;  %4522 = vmatprep.subr.mxu1 %v4863_v11 }
 0x320   :  { %v2488_v42 = vmul.f32 %v4799_v61, %v4783_v18 }
 0x321   :  { %2495 = vst.msk [vmem:[#allocation4 + $0x20] sm:$0xff] %vm1782_vm2, %v2487_v41  ;;  %4510 = vmatmul.mubr.msk.f32.vlgmr.msra.gmra.mrb[38].mxu0 %vm1782_vm2, %v2487_v41  ;;  %v3703_v41 = vld [vmem:[%s5484_s6 + $0x8] sm:$0xff] }
 0x322   :  { %2496 = vst.msk [vmem:[#allocation4 + $0x28] sm:$0xff] %vm1782_vm2, %v2488_v42  ;;  %4515 = vmatmul.mubr.msk.f32.vlgmr.msra.gmra.mrb[34].mxu1 %vm1782_vm2, %v2488_v42  ;;  %4518 = vmatpush3.msra.mxu0 %v5270_v0  ;;  %v83_v0 = vld [vmem:[%s5483_s5] sm:$0xff]  ;;  %v3704_v42 = vld [vmem:[%s5484_s6 + $0x10] sm:$0xff] }
 0x323   :  { %4523 = vmatpush3.msra.mxu1 %v5274_v5  ;;  %4519 = vmatprep.mubr.msk.f32.mxu0 %vm4862_vm0, %v4863_v11  ;;  %v84_v5 = vld [vmem:[%s5483_s5 + $0x8] sm:$0xff] }
 0x324   :  { %4524 = vmatprep.mubr.msk.f32.mxu1 %vm4862_vm0, %v4863_v11  ;;  %4527 = vmatprep.subr.mxu0 %v4863_v11 }
 0x325   :  { %4532 = vmatprep.subr.mxu1 %v4863_v11 }
 0x326   :  { %v4801_v2 = vpop.eup %4800 }
 0x327   :  { %v4803_v43 = vpop.eup %4802  ;;  %v2489_v44 = vmul.f32 %v4801_v2, %v5304_v21 }
 0x328   :  { %v2490_v45 = vmul.f32 %v4803_v43, %v5306_v22  ;;  %v3705_v43 = vld [vmem:[%s5484_s6 + $0x18] sm:$0xff] }
 0x329   :  { %2497 = vst.msk [vmem:[#allocation4 + $0x30] sm:$0xff] %vm1782_vm2, %v2489_v44  ;;  %4520 = vmatmul.mubr.msk.f32.vlgmr.msra.gmra.mrb[40].mxu0 %vm1782_vm2, %v2489_v44  ;;  %v4745_v44 = vpack.c.bf16 %v3705_v43, %v3704_v42 }
 0x32a   :  { %2498 = vst.msk [vmem:[#allocation4 + $0x38] sm:$0xff] %vm1782_vm2, %v2490_v45  ;;  %4525 = vmatmul.mubr.msk.f32.vlgmr.msra.gmra.mrb[36].mxu1 %vm1782_vm2, %v2490_v45  ;;  %4529 = vmatprep.mubr.msk.f32.mxu0 %vm4862_vm0, %v4863_v11  ;;  %v3789_v45 = vld [vmem:[%s5485_s7] sm:$0xff] }
 0x32b   :  { %4534 = vmatprep.mubr.msk.f32.mxu1 %vm4862_vm0, %v4863_v11  ;;  %4528 = vmatpush3.msra.mxu0 %v83_v0 }
 0x32c   :  { %4537 = vmatprep.subr.mxu0 %v4863_v11  ;;  %4533 = vmatpush3.msra.mxu1 %v84_v5 }
 0x32d   :  { %4542 = vmatprep.subr.mxu1 %v4863_v11 }
 0x3e4   :  { %v2568_v47 = vpop.f32.mrb[34].mxu0 }
 0x3e5   :  { %v4491_v48 = vpop.f32.mrb[35].mxu0  ;;  %4530 = vmatmul.mubr.msk.f32.vlgmr.msra.gmra.mrb[42].mxu0 %vm1782_vm2, %v2568_v47  ;;  %v3792_v47 = vld [vmem:[%s5485_s7 + $0x18] sm:$0xff] }
 0x3e6   :  { %4538 = vmatpush3.msra.mxu0 %v85_v46  ;;  %4539 = vmatprep.mubr.msk.f32.mxu0 %vm4862_vm0, %v4863_v11 }
 0x3e7   :  { %4547 = vmatprep.subr.mxu0 %v4863_v11 }
 0x3e8   :  { %v2641_v50 = vpop.f32.mrb[30].mxu1 }
 0x3e9   :  { %v4496_v51 = vpop.f32.mrb[31].mxu1  ;;  %4535 = vmatmul.mubr.msk.f32.vlgmr.msra.gmra.mrb[38].mxu1 %vm1782_vm2, %v2641_v50  ;;  %v3794_v50 = vld [vmem:[%s5485_s7 + $0x28] sm:$0xff] }
 0x3ea   :  { %4543 = vmatpush3.msra.mxu1 %v86_v49  ;;  %4544 = vmatprep.mubr.msk.f32.mxu1 %vm4862_vm0, %v4863_v11 }
 0x3eb   :  { %4552 = vmatprep.subr.mxu1 %v4863_v11 }
 0x3ec   :  { %v2714_v52 = vpop.f32.mrb[36].mxu0 }
 0x3ed   :  { %v4501_v53 = vpop.f32.mrb[37].mxu0  ;;  %4540 = vmatmul.mubr.msk.f32.vlgmr.msra.gmra.mrb[44].mxu0 %vm1782_vm2, %v2714_v52 }
 0x3ee   :  { %4548 = vmatpush3.msra.mxu0 %v83_v0  ;;  %4549 = vmatprep.mubr.msk.f32.mxu0 %vm4862_vm0, %v4863_v11  ;;  %v3790_v0 = vld [vmem:[%s5485_s7 + $0x8] sm:$0xff] }
 0x3ef   :  { %4557 = vmatprep.subr.mxu0 %v4863_v11 }
 0x3f0   :  { %v2787_v54 = vpop.f32.mrb[32].mxu1 }
 0x3f1   :  { %v4506_v55 = vpop.f32.mrb[33].mxu1  ;;  %4545 = vmatmul.mubr.msk.f32.vlgmr.msra.gmra.mrb[40].mxu1 %vm1782_vm2, %v2787_v54 }
 0x3f2   :  { %4553 = vmatpush3.msra.mxu1 %v84_v5  ;;  %4554 = vmatprep.mubr.msk.f32.mxu1 %vm4862_vm0, %v4863_v11  ;;  %v3791_v5 = vld [vmem:[%s5485_s7 + $0x10] sm:$0xff] }
 0x3f3   :  { %4562 = vmatprep.subr.mxu1 %v4863_v11  ;;  %v4753_v48 = vpack.c.bf16 %v3792_v47, %v3791_v5 }
 0x3f4   :  { %v2860_v56 = vpop.f32.mrb[38].mxu0 }
 0x3f5   :  { %v2933_v58 = vpop.f32.mrb[34].mxu1  ;;  %v4511_v59 = vpop.f32.mrb[39].mxu0  ;;  %4550 = vmatmul.mubr.msk.f32.vlgmr.msra.gmra.mrb[46].mxu0 %vm1782_vm2, %v2860_v56 }
 0x3f6   :  { %v4516_v62 = vpop.f32.mrb[35].mxu1  ;;  %4555 = vmatmul.mubr.msk.f32.vlgmr.msra.gmra.mrb[42].mxu1 %vm1782_vm2, %v2933_v58  ;;  %4558 = vmatpush3.msra.mxu0 %v85_v46  ;;  %v4749_v46 = vpack.c.bf16 %v3790_v0, %v3789_v45 }
 0x3f7   :  { %4559 = vmatprep.mubr.msk.f32.mxu0 %vm4862_vm0, %v4863_v11  ;;  %4563 = vmatpush3.msra.mxu1 %v86_v49  ;;  %v3793_v49 = vld [vmem:[%s5485_s7 + $0x20] sm:$0xff] }
 0x3f8   :  { %4564 = vmatprep.mubr.msk.f32.mxu1 %vm4862_vm0, %v4863_v11  ;;  %v4812_v11 = vld [vmem:[%s5478_s0] sm:$0xff]  ;;  %4750 = vmatprep.subr.bf16.mxu1 %v4749_v46  ;;  %v4757_v51 = vpack.c.bf16 %v3794_v50, %v3793_v49 }
 0x3fc   :  { %v3006_v63 = vpop.f32.mrb[40].mxu0 }
 0x3fd   :  { %v3079_v1 = vpop.f32.mrb[36].mxu1  ;;  %v4521_v4 = vpop.f32.mrb[41].mxu0  ;;  %4560 = vmatmul.mubr.msk.f32.vlgmr.msra.gmra.mrb[48].mxu0 %vm1782_vm2, %v3006_v63 }
 0x3fe   :  { %v4526_v6 = vpop.f32.mrb[37].mxu1  ;;  %4565 = vmatmul.mubr.msk.f32.vlgmr.msra.gmra.mrb[44].mxu1 %vm1782_vm2, %v3079_v1  ;;  %v3795_v4 = vld [vmem:[%s5485_s7 + $0x30] sm:$0xff] }
 0x3ff   :  { %4752 = vmatpush3.bf16.msra.mxu1 %v4749_v46  ;;  %v3796_v6 = vld [vmem:[%s5485_s7 + $0x38] sm:$0xff]  ;;  %s4864_s7 = smov [#allocation4]  }
 0x400   :  { %4754 = vmatprep.subr.bf16.mxu1 %v4753_v48  ;;  %s3924_s27 = sshll.u32 %s4864_s7, 4  ;;  %s3925_s27 = int_to_ptr.vmem [resolvable:$true] %s3924_s27 }
 0x401   :  { %s4813_s28 = scalar_lea.vmem %s3925_s27, 1024  ;;  %p4818_p1 = scmp.lt.s32.totalorder %s3925_s27, %s3925_s27 }
 0x402   :  { %p4814_p0 = scmp.ne.s32.totalorder %s3925_s27, %s4813_s28  ;;  %p4819_p2 = scmp.lt.s32.totalorder %s4813_s28, %s4813_s28 }
 0x403   :  { %4756 = vmatpush3.bf16.msra.mxu1 %v4753_v48 }
 0x404   :  { %4758 = vmatprep.subr.bf16.mxu1 %v4757_v51  ;;  %p4820_p3 = por %p4819_p2, %p4818_p1 }
 0x406   :  { %p4821_p4 = pnand %p4820_p3, %p4814_p0 }
 0x407   :  { %4760 = vmatpush3.bf16.msra.mxu1 %v4757_v51 }
 0x4b8   :  { %v3152_v7 = vpop.f32.mrb[42].mxu0 }
 0x4b9   :  { %v4531_v8 = vpop.f32.mrb[43].mxu0 }
 0x4bc   :  { %v3225_v9 = vpop.f32.mrb[38].mxu1 }
 0x4bd   :  { %v3667_v10 = vadd.f32 %v3225_v9, %v3152_v7  ;;  %v4536_v12 = vpop.f32.mrb[39].mxu1  ;;  %v4761_v7 = vpack.c.bf16 %v3796_v6, %v3795_v4 }
 0x4bf   :  { %4762 = vmatprep.subr.bf16.mxu1 %v4761_v7 }
 0x4c0   :  { %v3298_v13 = vpop.f32.mrb[44].mxu0  ;;  %4764 = vmatpush3.bf16.msra.mxu1 %v4761_v7 }
 0x4c1   :  { %v3669_v14 = vadd.f32 %v3667_v10, %v3298_v13  ;;  %v4541_v15 = vpop.f32.mrb[45].mxu0 }
 0x4c4   :  { %v3371_v16 = vpop.f32.mrb[40].mxu1 }
 0x4c5   :  { %v3671_v17 = vadd.f32 %v3669_v14, %v3371_v16  ;;  %v4546_v3 = vpop.f32.mrb[41].mxu1 }
 0x4c7   :  { %v3673_v18 = vadd.f32 %v4812_v11, %v3671_v17 }
 0x4c8   :  { %v3444_v19 = vpop.f32.mrb[46].mxu0 }
 0x4c9   :  { %v3517_v20 = vpop.f32.mrb[42].mxu1  ;;  %v4551_v21 = vpop.f32.mrb[47].mxu0  ;;  %v3675_v22 = vsel %vm87_vm1, %v3673_v18, 0.0 }
 0x4ca   :  { %v3668_v23 = vadd.f32 %v3517_v20, %v3444_v19  ;;  %v4556_v24 = vpop.f32.mrb[43].mxu1  ;;  %3676 = vadd.xlane.f32.xlu0 %v3675_v22 }
 0x4d0   :  { %v3590_v25 = vpop.f32.mrb[48].mxu0 }
 0x4d1   :  { %v3670_v26 = vadd.f32 %v3668_v23, %v3590_v25  ;;  %v3663_v28 = vpop.f32.mrb[44].mxu1  ;;  %v4561_v29 = vpop.f32.mrb[49].mxu0 }
 0x4d2   :  { %v4566_v30 = vpop.f32.mrb[45].mxu1 }
 0x4d3   :  { %v3672_v31 = vadd.f32 %v3670_v26, %v3663_v28 }
 0x4d5   :  { %v3674_v32 = vadd.f32 %v3672_v31, %v5006_v27  ;;  %v3702_v27 = vld [vmem:[%s5484_s6] sm:$0xff] }
 0x4d6   :  { %v4741_v2 = vpack.c.bf16 %v3703_v41, %v3702_v27 }
 0x4d7   :  { %v3678_v33 = vsel %vm87_vm1, %v3674_v32, 0.0 }
 0x4d8   :  { %3679 = vadd.xlane.f32.xlu1 %v3678_v33  ;;  %4742 = vmatprep.subr.bf16.mxu0 %v4741_v2 }
 0x4d9   :  { %4744 = vmatpush3.bf16.msra.mxu0 %v4741_v2 }
 0x4da   :  { %4746 = vmatprep.subr.bf16.mxu0 %v4745_v44 }
 0x4dd   :  { %4748 = vmatpush3.bf16.msra.mxu0 %v4745_v44 }
 0x557   :  { %v3677_v34 = vpop.xlane.xlu0 %3676 }
 0x558   :  { %v3682_v35 = vmul.f32 0.03125, %v3677_v34 }
 0x55a   :  { %v3684_v36 = vsub.f32 %v3673_v18, %v3682_v35 }
 0x55c   :  { %v3686_v57 = vmul.f32 %v3684_v36, %v3684_v36 }
 0x55e   :  { %v3688_v37 = vsel %vm87_vm1, %v3686_v57, 0.0 }
 0x55f   :  { %3689 = vadd.xlane.f32.xlu0 %v3688_v37 }
 0x565   :  { %v3680_v38 = vpop.xlane.xlu1 %3679 }
 0x566   :  { %v3683_v39 = vmul.f32 0.03125, %v3680_v38 }
 0x568   :  { %v3685_v60 = vsub.f32 %v3674_v32, %v3683_v39 }
 0x56a   :  { %v3687_v40 = vmul.f32 %v3685_v60, %v3685_v60 }
 0x56c   :  { %v3691_v61 = vsel %vm87_vm1, %v3687_v40, 0.0 }
 0x56d   :  { %3692 = vadd.xlane.f32.xlu1 %v3691_v61 }
 0x5ec   :  { %v3690_v52 = vpop.xlane.xlu0 %3689 }
 0x5ed   :  { %v3694_v53 = vmul.f32 0.03125, %v3690_v52 }
 0x5ef   :  { %v3696_v54 = vadd.f32 1e-05, %v3694_v53 }
 0x5f1   :  { %4804 = vrsqrt.f32 %v3696_v54 }
 0x5fa   :  { %v3693_v55 = vpop.xlane.xlu1 %3692 }
 0x5fb   :  { %v4805_v56 = vpop.eup %4804  ;;  %v3695_v58 = vmul.f32 0.03125, %v3693_v55 }
 0x5fc   :  { %v3700_v59 = vmul.f32 %v4805_v56, %v3684_v36 }
 0x5fd   :  { %v3697_v62 = vadd.f32 1e-05, %v3695_v58 }
 0x5fe   :  { %4575 = vmatprep.mubr.msk.f32.mxu0 %vm87_vm1, %v3700_v59 }
 0x5ff   :  { %4806 = vrsqrt.f32 %v3697_v62 }
 0x609   :  { %v4807_v63 = vpop.eup %4806 }
 0x60a   :  { %v3701_v1 = vmul.f32 %v4807_v63, %v3685_v60 }
 0x60c   :  { %4576 = vmatmul.mubr.msk.f32.vlgmr.msra.gmra.mrb[50].mxu0 %vm87_vm1, %v3701_v1 }
 0x6df   :  { %v4577_v8 = vpop.f32.mrb[50].mxu0 }
 0x6e0   :  { %v3778_v9 = vpop.f32.mrb[51].mxu0  ;;  %v3788_v12 = vmax.f32 %v4577_v8, 0.0 }
 0x6e1   :  { %v3787_v10 = vmax.f32 %v3778_v9, 0.0 }
 0x6e3   :  { %4594 = vmatprep.mubr.msk.f32.mxu1 %vm3797_vm5, %v3787_v10 }
 0x6e4   :  { %4595 = vmatmul.mubr.msk.f32.vlgmr.msra.gmra.mrb[46].mxu1 %vm3797_vm5, %v3788_v12 }
 0x7b7   :  { %v4596_v13 = vpop.f32.mrb[46].mxu1 }
 0x7b8   :  { %v3876_v14 = vadd.f32 %v4596_v13, %v3701_v1  ;;  %v3870_v15 = vpop.f32.mrb[47].mxu1 }
 0x7b9   :  { %v3871_v16 = vadd.f32 %v3870_v15, %v3700_v59 }
 0x7ba   :  { %v3882_v17 = vsel %vm87_vm1, %v3876_v14, 0.0 }
 0x7bb   :  { %3883 = vadd.xlane.f32.xlu1 %v3882_v17  ;;  %v3879_v3 = vsel %vm87_vm1, %v3871_v16, 0.0 }
 0x7bc   :  { %3880 = vadd.xlane.f32.xlu0 %v3879_v3 }
 0x848   :  { %v3884_v11 = vpop.xlane.xlu1 %3883 }
 0x849   :  { %v3886_v18 = vmul.f32 0.03125, %v3884_v11  ;;  %v3881_v19 = vpop.xlane.xlu0 %3880 }
 0x84a   :  { %v3885_v20 = vmul.f32 0.03125, %v3881_v19 }
 0x84b   :  { %v3888_v21 = vsub.f32 %v3876_v14, %v3886_v18 }
 0x84c   :  { %v3887_v22 = vsub.f32 %v3871_v16, %v3885_v20 }
 0x84d   :  { %v3890_v23 = vmul.f32 %v3888_v21, %v3888_v21 }
 0x84e   :  { %v3889_v24 = vmul.f32 %v3887_v22, %v3887_v22 }
 0x84f   :  { %v3894_v25 = vsel %vm87_vm1, %v3890_v23, 0.0 }
 0x850   :  { %3895 = vadd.xlane.f32.xlu1 %v3894_v25  ;;  %v3891_v26 = vsel %vm87_vm1, %v3889_v24, 0.0 }
 0x851   :  { %3892 = vadd.xlane.f32.xlu0 %v3891_v26 }
 0x852   :  { %4824 = shalt.err (!%p4821_p4)
}
 0x853   :  { %s4825_s0 = scalar_lea.hbm %s5487_s9, 1024 }
 0x854   :  { %p4826_p5 = scmp.ne.s32.totalorder %s5487_s9, %s4825_s0  ;;  %p4829_p6 = scmp.lt.u32.totalorder %s4825_s0, %s5487_s9 }
 0x856   :  { %p4831_p7 = pnand %p4829_p6, %p4826_p5 }
 0x858   :  { %4834 = shalt.err (!%p4831_p7)
}
 0x859   :  { %s4865_s12 = smov 128   ;;  %s4866_s13 = smov 8  }
 0x85a   :  { %3930 = dma.vmem_to_hbm [thread:$0]  %s3925_s27, 1024, %s5487_s9, [#allocation5], %s4865_s12, %s4865_s12, %s4866_s13  }
 0x85b   :  { %s4867_s16 = smov [#allocation2]  }
 0x85c   :  { %s3912_s17 = sshll.u32 %s4867_s16, 4  ;;  %s3913_s17 = int_to_ptr.vmem [resolvable:$true] %s3912_s17 }
 0x85d   :  { %s4835_s9 = scalar_lea.vmem %s3913_s17, 256  ;;  %p4840_p9 = scmp.lt.s32.totalorder %s3913_s17, %s3913_s17 }
 0x85e   :  { %p4836_p8 = scmp.ne.s32.totalorder %s3913_s17, %s4835_s9  ;;  %p4841_p10 = scmp.lt.s32.totalorder %s4835_s9, %s4835_s9 }
 0x860   :  { %p4842_p11 = por %p4841_p10, %p4840_p9 }
 0x862   :  { %p4843_p12 = pnand %p4842_p11, %p4836_p8 }
 0x8dd   :  { %v3896_v28 = vpop.xlane.xlu1 %3895 }
 0x8de   :  { %v3898_v29 = vmul.f32 0.03125, %v3896_v28  ;;  %v3893_v30 = vpop.xlane.xlu0 %3892 }
 0x8df   :  { %v3897_v31 = vmul.f32 0.03125, %v3893_v30 }
 0x8e0   :  { %v3900_v32 = vadd.f32 1e-05, %v3898_v29 }
 0x8e1   :  { %v3899_v33 = vadd.f32 1e-05, %v3897_v31 }
 0x8e2   :  { %4808 = vrsqrt.f32 %v3900_v32 }
 0x8e3   :  { %4810 = vrsqrt.f32 %v3899_v33 }
 0x8ec   :  { %v4809_v34 = vpop.eup %4808 }
 0x8ed   :  { %v4811_v35 = vpop.eup %4810  ;;  %v3904_v36 = vmul.f32 %v4809_v34, %v3888_v21 }
 0x8ee   :  { %v3903_v57 = vmul.f32 %v4811_v35, %v3887_v22 }
 0x8ef   :  { %3906 = vst.msk [vmem:[#allocation2 + $0x8] sm:$0xff] %vm87_vm1, %v3904_v36 }
 0x8f0   :  { %3905 = vst.msk [vmem:[#allocation2] sm:$0xff] %vm87_vm1, %v3903_v57 }
 0x8f1   :  { %4846 = shalt.err (!%p4843_p12)
}
 0x8f2   :  { %s4847_s4 = scalar_lea.hbm %s5486_s8, 256 }
 0x8f3   :  { %p4848_p13 = scmp.ne.s32.totalorder %s5486_s8, %s4847_s4  ;;  %p4851_p0 = scmp.lt.u32.totalorder %s4847_s4, %s5486_s8 }
 0x8f5   :  { %p4853_p1 = pnand %p4851_p0, %p4848_p13 }
 0x8f7   :  { %4856 = shalt.err (!%p4853_p1)
}
 0x8f8   :  { %3918 = dma.vmem_to_hbm [thread:$0]  %s3913_s17, 256, %s5486_s8, [#allocation3], %s4865_s12, %s4865_s12, %s4866_s13  }
 0x8f9   :  { %4857 = dma.done.wait [#allocation3], 256  }
 0x8fa   :  { %4858 = vsyncadd [#allocation3], 4294967040 }
 0x8fb   :  { %4859 = dma.done.wait [#allocation5], 1024  }
 0x8fc   :  { %4860 = vsyncadd [#allocation5], 4294966272 }
 0x8fd   :  { %3937 = vsyncpa [#allocation3], 1 }
 0x8fe   :  { %3938 = vsyncpa [#allocation5], 1 }

</bundles_post_ra>
